<compile_context>
chip_gen: v5e
topology: v5e:2x2
jax: 0.10.0
libtpu: 0.0.40
codegen_flags: <defaults>
</compile_context>

<pallas_src>
import jax
import jax.numpy as jnp
from jax.experimental import pallas as pl
from jax.experimental.pallas import tpu as pltpu


def _round_up(n, m):
    return (n + m - 1) // m * m


def _fused_mlp_kernel(x_ref, w1_ref, b1_ref, w2_ref, b2_ref, o_ref):
    """out = (relu(relu(x@w1+b1)@w1+b1)) @ w2 + b2, fully fused in VMEM.

    x: (bm, H) bf16; w1: (H, H) bf16; b1: (1, H) f32;
    w2: (H, OUT_PAD) bf16; b2: (1, OUT_PAD) f32; o: (bm, OUT_PAD) f32.
    """
    # Load w1 / b1 once and reuse for both fc1 applications.
    w1 = w1_ref[...]
    b1 = b1_ref[...]

    # fc1 + ReLU (bf16 MXU operands, f32 accumulate, f32 epilogue)
    h = jnp.dot(x_ref[...], w1, preferred_element_type=jnp.float32)
    h = jnp.maximum(h + b1, 0.0)

    # fc1 again + ReLU (as written in the PyTorch forward)
    h = jnp.dot(h.astype(jnp.bfloat16), w1, preferred_element_type=jnp.float32)
    h = jnp.maximum(h + b1, 0.0)

    # fc2 (output feature dim pre-padded to a multiple of 128 -> lane-dense store)
    out = jnp.dot(h.astype(jnp.bfloat16), w2_ref[...],
                  preferred_element_type=jnp.float32)
    o_ref[...] = (out + b2_ref[...]).astype(o_ref.dtype)


def _fused_mlp(x, w1, b1, w2p, b2p, *, block_m=128):
    """Single fused pallas_call. x:(B,H) f32/bf16; returns (B_pad, OUT_PAD) f32."""
    B, H = x.shape
    out_pad = w2p.shape[1]

    # Tile the batch axis; pad rows up to a sublane-aligned block.
    bm = min(block_m, _round_up(B, 8))
    B_pad = _round_up(B, bm)
    if B_pad != B:
        x = jnp.pad(x, ((0, B_pad - B), (0, 0)))
    x = x.astype(jnp.bfloat16)

    grid = (B_pad // bm,)
    return pl.pallas_call(
        _fused_mlp_kernel,
        out_shape=jax.ShapeDtypeStruct((B_pad, out_pad), jnp.float32),
        grid=grid,
        in_specs=[
            pl.BlockSpec((bm, H), lambda i: (i, 0)),        # x tile (per grid step)
            pl.BlockSpec((H, H), lambda i: (0, 0)),         # w1 (VMEM-resident)
            pl.BlockSpec((1, H), lambda i: (0, 0)),         # b1
            pl.BlockSpec((H, out_pad), lambda i: (0, 0)),   # w2 (padded)
            pl.BlockSpec((1, out_pad), lambda i: (0, 0)),   # b2 (padded)
        ],
        out_specs=pl.BlockSpec((bm, out_pad), lambda i: (i, 0)),
        compiler_params=pltpu.CompilerParams(
            dimension_semantics=("parallel",),
        ),
    )(x, w1, b1, w2p, b2p)


def classde2_forward(x, params, out_features):
    """Forward pass of Classde2 using one fused Pallas kernel."""
    w1, b1, w2p, b2p = params
    B = x.shape[0]
    out = _fused_mlp(x, w1, b1, w2p, b2p)
    return out[:B, :out_features]


def classde2_reference(x, params, out_features):
    """Pure-JAX reference with the same bf16/f32 mixed precision."""
    w1, b1, w2p, b2p = params
    h = jnp.dot(x.astype(jnp.bfloat16), w1, preferred_element_type=jnp.float32)
    h = jnp.maximum(h + b1, 0.0)
    h = jnp.dot(h.astype(jnp.bfloat16), w1, preferred_element_type=jnp.float32)
    h = jnp.maximum(h + b1, 0.0)
    out = jnp.dot(h.astype(jnp.bfloat16), w2p, preferred_element_type=jnp.float32)
    out = out + b2p
    return out[:, :out_features]


def init_params(key, hidden_features, out_features):
    """Deterministic synthetic init (PyTorch-style fan-in uniform).

    Linear weights are stored pre-transposed as (in, out) so the kernel
    computes y = x @ W + b (== PyTorch's x @ W.T + b). fc2's weight/bias are
    zero-padded on the output axis up to a multiple of 128 lanes, and the
    matmul operands are stored in bf16 (biases stay f32 for the epilogue).
    """
    k1, k2, k3, k4 = jax.random.split(key, 4)
    bound = 1.0 / (hidden_features ** 0.5)
    w1 = jax.random.uniform(k1, (hidden_features, hidden_features),
                            jnp.float32, -bound, bound)
    b1 = jax.random.uniform(k2, (1, hidden_features), jnp.float32, -bound, bound)
    w2 = jax.random.uniform(k3, (hidden_features, out_features),
                            jnp.float32, -bound, bound)
    b2 = jax.random.uniform(k4, (1, out_features), jnp.float32, -bound, bound)

    out_pad = max(_round_up(out_features, 128), 128)
    w2p = jnp.zeros((hidden_features, out_pad), jnp.float32)
    w2p = w2p.at[:, :out_features].set(w2)
    b2p = jnp.zeros((1, out_pad), jnp.float32)
    b2p = b2p.at[:, :out_features].set(b2)

    return (w1.astype(jnp.bfloat16), b1, w2p.astype(jnp.bfloat16), b2p)


if __name__ == "__main__":
    # Small shapes consistent with the module: square fc1 (H x H), fc2 -> 51 classes.
    B = 8
    HIDDEN = 256
    OUT = 51

    key = jax.random.PRNGKey(0)
    kx, kp = jax.random.split(key)
    x = jax.random.normal(kx, (B, HIDDEN), jnp.float32)
    params = init_params(kp, HIDDEN, OUT)

    out = classde2_forward(x, params, OUT)
    out = jax.block_until_ready(out)

    ref = classde2_reference(x, params, OUT)
    assert out.shape == (B, OUT)
    assert jnp.allclose(out, ref, atol=2e-2, rtol=2e-2), "mismatch vs reference"

    # TODO(synk): nn.Dropout / nn.Sigmoid are instantiated but unused in
    # Classde2.forward, so they are intentionally not implemented.
    print("KERNEL_OK")
</pallas_src>

<mosaic_0001>
module attributes {stable_mosaic.version = 11 : i64} {
  func.func @_fused_mlp_kernel(%arg0: i32, %arg1: memref<8x256xbf16, #tpu.memory_space<vmem>>, %arg2: memref<256x256xbf16, #tpu.memory_space<vmem>>, %arg3: memref<1x256xf32, #tpu.memory_space<vmem>>, %arg4: memref<256x128xbf16, #tpu.memory_space<vmem>>, %arg5: memref<1x128xf32, #tpu.memory_space<vmem>>, %arg6: memref<8x128xf32, #tpu.memory_space<vmem>>) attributes {dimension_semantics = [#tpu.dimension_semantics<parallel>], iteration_bounds = array<i64: 1>, scalar_prefetch = 0 : i64, scratch_operands = 0 : i64, tpu.core_type = #tpu.core_type<tc>, window_params = [{transform_indices = @transform_0, window_bounds = array<i64: 8, 256>}, {pipeline_mode = #tpu.pipeline_mode<synchronous>, transform_indices = @transform_1, window_bounds = array<i64: 256, 256>}, {pipeline_mode = #tpu.pipeline_mode<synchronous>, transform_indices = @transform_2, window_bounds = array<i64: 1, 256>}, {pipeline_mode = #tpu.pipeline_mode<synchronous>, transform_indices = @transform_3, window_bounds = array<i64: 256, 128>}, {pipeline_mode = #tpu.pipeline_mode<synchronous>, transform_indices = @transform_4, window_bounds = array<i64: 1, 128>}, {transform_indices = @transform_5, window_bounds = array<i64: 8, 128>}]} {
    %c0 = arith.constant 0 : index
    %c0_0 = arith.constant 0 : index
    %0 = vector.load %arg2[%c0, %c0_0] : memref<256x256xbf16, #tpu.memory_space<vmem>>, vector<256x256xbf16>
    %c0_1 = arith.constant 0 : index
    %c0_2 = arith.constant 0 : index
    %1 = vector.load %arg3[%c0_1, %c0_2] : memref<1x256xf32, #tpu.memory_space<vmem>>, vector<1x256xf32>
    %c0_3 = arith.constant 0 : index
    %c0_4 = arith.constant 0 : index
    %2 = vector.load %arg1[%c0_3, %c0_4] : memref<8x256xbf16, #tpu.memory_space<vmem>>, vector<8x256xbf16>
    %cst = arith.constant dense<0.000000e+00> : vector<8x256xf32>
    %3 = tpu.matmul %2, %0, %cst {dimension_numbers = #tpu.dot_dimension_numbers<[1], [0], [0], [1], [0, 0, 1, 1], [], []>} : vector<8x256xbf16>, vector<256x256xbf16>, vector<8x256xf32> -> vector<8x256xf32>
    %4 = vector.broadcast %1 : vector<1x256xf32> to vector<8x256xf32>
    %5 = arith.addf %3, %4 : vector<8x256xf32>
    %cst_5 = arith.constant 0.000000e+00 : f32
    %6 = vector.broadcast %cst_5 : f32 to vector<8x256xf32>
    %7 = arith.maximumf %5, %6 : vector<8x256xf32>
    %8 = arith.truncf %7 : vector<8x256xf32> to vector<8x256xbf16>
    %cst_6 = arith.constant dense<0.000000e+00> : vector<8x256xf32>
    %9 = tpu.matmul %8, %0, %cst_6 {dimension_numbers = #tpu.dot_dimension_numbers<[1], [0], [0], [1], [0, 0, 1, 1], [], []>} : vector<8x256xbf16>, vector<256x256xbf16>, vector<8x256xf32> -> vector<8x256xf32>
    %10 = vector.broadcast %1 : vector<1x256xf32> to vector<8x256xf32>
    %11 = arith.addf %9, %10 : vector<8x256xf32>
    %cst_7 = arith.constant 0.000000e+00 : f32
    %12 = vector.broadcast %cst_7 : f32 to vector<8x256xf32>
    %13 = arith.maximumf %11, %12 : vector<8x256xf32>
    %14 = arith.truncf %13 : vector<8x256xf32> to vector<8x256xbf16>
    %c0_8 = arith.constant 0 : index
    %c0_9 = arith.constant 0 : index
    %15 = vector.load %arg4[%c0_8, %c0_9] : memref<256x128xbf16, #tpu.memory_space<vmem>>, vector<256x128xbf16>
    %cst_10 = arith.constant dense<0.000000e+00> : vector<8x128xf32>
    %16 = tpu.matmul %14, %15, %cst_10 {dimension_numbers = #tpu.dot_dimension_numbers<[1], [0], [0], [1], [0, 0, 1, 1], [], []>} : vector<8x256xbf16>, vector<256x128xbf16>, vector<8x128xf32> -> vector<8x128xf32>
    %c0_11 = arith.constant 0 : index
    %c0_12 = arith.constant 0 : index
    %17 = vector.load %arg5[%c0_11, %c0_12] : memref<1x128xf32, #tpu.memory_space<vmem>>, vector<1x128xf32>
    %18 = vector.broadcast %17 : vector<1x128xf32> to vector<8x128xf32>
    %19 = arith.addf %16, %18 : vector<8x128xf32>
    %c0_13 = arith.constant 0 : index
    %c0_14 = arith.constant 0 : index
    %20 = vector.load %arg6[%c0_13, %c0_14] : memref<8x128xf32, #tpu.memory_space<vmem>>, vector<8x128xf32>
    tpu.vector_store %arg6[%c0_13, %c0_14], %19 {strides = array<i32>} : memref<8x128xf32, #tpu.memory_space<vmem>>, vector<8x128xf32>,
    return
  }
  func.func @transform_0(%arg0: i32) -> (i32, i32) {
    %c0_i32 = arith.constant 0 : i32
    %c0_i32_0 = arith.constant 0 : i32
    return %arg0, %c0_i32 : i32, i32
  }
  func.func @transform_1(%arg0: i32) -> (i32, i32) {
    %c0_i32 = arith.constant 0 : i32
    %c0_i32_0 = arith.constant 0 : i32
    %c0_i32_1 = arith.constant 0 : i32
    return %c0_i32, %c0_i32_0 : i32, i32
  }
  func.func @transform_2(%arg0: i32) -> (i32, i32) {
    %c0_i32 = arith.constant 0 : i32
    %c0_i32_0 = arith.constant 0 : i32
    %c0_i32_1 = arith.constant 0 : i32
    return %c0_i32, %c0_i32_0 : i32, i32
  }
  func.func @transform_3(%arg0: i32) -> (i32, i32) {
    %c0_i32 = arith.constant 0 : i32
    %c0_i32_0 = arith.constant 0 : i32
    %c0_i32_1 = arith.constant 0 : i32
    return %c0_i32, %c0_i32_0 : i32, i32
  }
  func.func @transform_4(%arg0: i32) -> (i32, i32) {
    %c0_i32 = arith.constant 0 : i32
    %c0_i32_0 = arith.constant 0 : i32
    %c0_i32_1 = arith.constant 0 : i32
    return %c0_i32, %c0_i32_0 : i32, i32
  }
  func.func @transform_5(%arg0: i32) -> (i32, i32) {
    %c0_i32 = arith.constant 0 : i32
    %c0_i32_0 = arith.constant 0 : i32
    return %arg0, %c0_i32 : i32, i32
  }
}

</mosaic_0001>

<bundles_post_ra>
// kernel: tpu_custom_call.1
= control target key start
LH: loop header
LB: loop body
LE: loop exit
PB: predicated region body
PF: predicated region fallthrough
CT: control target
= control target key end

     0   :  { %10 = vsyncpa [#allocation3], 0  ;;  %s1107_s0 = inlined_call_operand.hbm [shape: bf16[8,256], index: 0, kind: input, shape index: {}]   ;;  %s1108_s1 = inlined_call_operand.hbm [shape: bf16[256,256], index: 1, kind: input, shape index: {}]   ;;  %s1109_s2 = inlined_call_operand.hbm [shape: f32[1,256], index: 2, kind: input, shape index: {}]   ;;  %s1110_s3 = inlined_call_operand.hbm [shape: bf16[256,128], index: 3, kind: input, shape index: {}]   ;;  %s1111_s4 = inlined_call_operand.vmem [shape: f32[1,128], index: 4, kind: input, shape index: {}]   ;;  %s1112_s5 = inlined_call_operand.hbm [shape: f32[8,128], index: 5, kind: output, shape index: {}]  }
   0x1   :  { %11 = vsyncpa [#allocation6], 0 }
   0x2   :  { %12 = vsyncpa [#allocation9], 0  ;;  %s29_s20 = sshll.u32 %s1108_s1, 4  ;;  %s30_s20 = int_to_ptr.hbm [resolvable:$true] %s29_s20 }
   0x3   :  { %13 = vsyncpa [#allocation4], 0  ;;  %s954_s21 = smov [#allocation5]   ;;  %s19_s25 = sshll.u32 %s1107_s0, 4  ;;  %s20_s25 = int_to_ptr.hbm [resolvable:$true] %s19_s25 }
   0x4   :  { %s31_s22 = sshll.u32 %s954_s21, 4  ;;  %s955_s26 = smov 128   ;;  %s32_s22 = int_to_ptr.vmem [resolvable:$true] %s31_s22 }
   0x5   :  { %s956_s27 = smov 8   ;;  %s957_s28 = smov [#allocation2]  }
   0x6   :  { %37 = dma.hbm_to_vmem [thread:$0]  %s30_s20, 4096, %s32_s22, [#allocation6], %s955_s26, %s955_s26, %s956_s27  }
   0x7   :  { %s21_s29 = sshll.u32 %s957_s28, 4  ;;  %s43_s7 = sshll.u32 %s1109_s2, 4  ;;  %s22_s29 = int_to_ptr.vmem [resolvable:$true] %s21_s29  ;;  %s44_s7 = int_to_ptr.hbm [resolvable:$true] %s43_s7 }
   0x8   :  { %24 = dma.hbm_to_vmem [thread:$0]  %s20_s25, 128, %s22_s29, [#allocation3]  }
   0x9   :  { %s53_s9 = sshll.u32 %s1110_s3, 4  ;;  %s958_s10 = smov [#allocation7]   ;;  %s54_s9 = int_to_ptr.hbm [resolvable:$true] %s53_s9 }
   0xa   :  { %s45_s11 = sshll.u32 %s958_s10, 4  ;;  %s959_s0 = smov [#allocation8]   ;;  %s46_s11 = int_to_ptr.vmem [resolvable:$true] %s45_s11 }
   0xb   :  { %48 = dma.hbm_to_vmem [thread:$0]  %s44_s7, 32, %s46_s11, [#allocation6]  }
   0xc   :  { %s55_s12 = sshll.u32 %s959_s0, 4  ;;  %s960_s13 = smov 64   ;;  %s56_s12 = int_to_ptr.vmem [resolvable:$true] %s55_s12 }
   0xd   :  { %s961_s14 = smov 4  }
   0xe   :  { %61 = dma.hbm_to_vmem [thread:$0]  %s54_s9, 2048, %s56_s12, [#allocation9], %s960_s13, %s960_s13, %s961_s14  }
   0xf   :  { %946 = dma.done.wait [#allocation3], 128  }
  0x10   :  { %947 = vsyncadd [#allocation3], 4294967168 }
  0x11   :  { %948 = dma.done.wait [#allocation6], 4128  }
  0x12   :  { %949 = vsyncadd [#allocation6], 4294963168 }
  0x13   :  { %950 = dma.done.wait [#allocation9], 2048  }
  0x14   :  { %951 = vsyncadd [#allocation9], 4294965248  ;;  %v634_v0 = vld [vmem:[#allocation5 + $0x70] sm:$0xf]  ;;  %v783_v1 = vld [vmem:[#allocation5 + $0x74] sm:$0xf0] }
  0x15   :  { %v698_v2 = vld [vmem:[#allocation5 + $0xf0] sm:$0xf]  ;;  %v1005_v3 = vor.u32 %v783_v1, %v634_v0  ;;  %v799_v4 = vld [vmem:[#allocation5 + $0xf4] sm:$0xf0]  ;;  %v782_v5 = vld [vmem:[#allocation5 + $0x74] sm:$0xf] }
  0x16   :  { %v636_v6 = vld [vmem:[#allocation5 + $0x78] sm:$0xf0]  ;;  %v1007_v7 = vor.u32 %v799_v4, %v698_v2  ;;  %v798_v9 = vld [vmem:[#allocation5 + $0xf4] sm:$0xf]  ;;  %v626_v11 = vld [vmem:[#allocation5 + $0x60] sm:$0xf] }
  0x17   :  { %v1009_v8 = vor.u32 %v782_v5, %v636_v6  ;;  %v700_v10 = vld [vmem:[#allocation5 + $0xf8] sm:$0xf0]  ;;  %286 = vmatpush.bf16.msra.mxu0 %v1005_v3  ;;  %v781_v13 = vld [vmem:[#allocation5 + $0x64] sm:$0xf0]  ;;  %v690_v14 = vld [vmem:[#allocation5 + $0xe0] sm:$0xf] }
  0x18   :  { %v1012_v12 = vor.u32 %v798_v9, %v700_v10  ;;  %v797_v15 = vld [vmem:[#allocation5 + $0xe4] sm:$0xf0]  ;;  %299 = vmatpush.bf16.msra.mxu1 %v1007_v7  ;;  %v1016_v16 = vor.u32 %v781_v13, %v626_v11  ;;  %v780_v18 = vld [vmem:[#allocation5 + $0x64] sm:$0xf]  ;;  %v628_v19 = vld [vmem:[#allocation5 + $0x68] sm:$0xf0] }
  0x19   :  { %312 = vmatpush.bf16.msra.mxu2 %v1009_v8  ;;  %v1018_v17 = vor.u32 %v797_v15, %v690_v14  ;;  %v796_v20 = vld [vmem:[#allocation5 + $0xe4] sm:$0xf]  ;;  %v1021_v21 = vor.u32 %v780_v18, %v628_v19  ;;  %v692_v22 = vld [vmem:[#allocation5 + $0xe8] sm:$0xf0]  ;;  %v618_v23 = vld [vmem:[#allocation5 + $0x50] sm:$0xf] }
  0x1a   :  { %325 = vmatpush.bf16.msra.mxu3 %v1012_v12  ;;  %v779_v24 = vld [vmem:[#allocation5 + $0x54] sm:$0xf0]  ;;  %v1023_v25 = vor.u32 %v796_v20, %v692_v22  ;;  %v682_v26 = vld [vmem:[#allocation5 + $0xd0] sm:$0xf]  ;;  %v778_v28 = vld [vmem:[#allocation5 + $0x54] sm:$0xf] }
  0x1b   :  { %v795_v27 = vld [vmem:[#allocation5 + $0xd4] sm:$0xf0]  ;;  %287 = vmatpush.bf16.msra.mxu0 %v1016_v16  ;;  %v1026_v29 = vor.u32 %v779_v24, %v618_v23  ;;  %v620_v30 = vld [vmem:[#allocation5 + $0x58] sm:$0xf0]  ;;  %v794_v31 = vld [vmem:[#allocation5 + $0xd4] sm:$0xf] }
  0x1c   :  { %v684_v32 = vld [vmem:[#allocation5 + $0xd8] sm:$0xf0]  ;;  %300 = vmatpush.bf16.msra.mxu1 %v1018_v17  ;;  %v1030_v33 = vor.u32 %v795_v27, %v682_v26  ;;  %v1032_v34 = vor.u32 %v778_v28, %v620_v30  ;;  %v610_v35 = vld [vmem:[#allocation5 + $0x40] sm:$0xf]  ;;  %v777_v36 = vld [vmem:[#allocation5 + $0x44] sm:$0xf0] }
  0x1d   :  { %313 = vmatpush.bf16.msra.mxu2 %v1021_v21  ;;  %v674_v37 = vld [vmem:[#allocation5 + $0xc0] sm:$0xf]  ;;  %v1035_v38 = vor.u32 %v794_v31, %v684_v32  ;;  %v793_v39 = vld [vmem:[#allocation5 + $0xc4] sm:$0xf0]  ;;  %v776_v40 = vld [vmem:[#allocation5 + $0x44] sm:$0xf]  ;;  %v1038_v44 = vor.u32 %v777_v36, %v610_v35 }
  0x1e   :  { %326 = vmatpush.bf16.msra.mxu3 %v1023_v25  ;;  %v612_v41 = vld [vmem:[#allocation5 + $0x48] sm:$0xf0]  ;;  %v792_v42 = vld [vmem:[#allocation5 + $0xc4] sm:$0xf]  ;;  %v1042_v45 = vor.u32 %v793_v39, %v674_v37  ;;  %v602_v47 = vld [vmem:[#allocation5 + $0x30] sm:$0xf] }
  0x1f   :  { %v676_v43 = vld [vmem:[#allocation5 + $0xc8] sm:$0xf0]  ;;  %288 = vmatpush.bf16.msra.mxu0 %v1026_v29  ;;  %v1044_v46 = vor.u32 %v776_v40, %v612_v41  ;;  %v775_v48 = vld [vmem:[#allocation5 + $0x34] sm:$0xf0]  ;;  %v666_v49 = vld [vmem:[#allocation5 + $0xb0] sm:$0xf] }
  0x20   :  { %301 = vmatpush.bf16.msra.mxu1 %v1030_v33  ;;  %v1047_v50 = vor.u32 %v792_v42, %v676_v43  ;;  %v791_v51 = vld [vmem:[#allocation5 + $0xb4] sm:$0xf0]  ;;  %v774_v52 = vld [vmem:[#allocation5 + $0x34] sm:$0xf]  ;;  %v604_v53 = vld [vmem:[#allocation5 + $0x38] sm:$0xf0]  ;;  %v1050_v56 = vor.u32 %v775_v48, %v602_v47 }
  0x21   :  { %314 = vmatpush.bf16.msra.mxu2 %v1032_v34  ;;  %v790_v54 = vld [vmem:[#allocation5 + $0xb4] sm:$0xf]  ;;  %v668_v55 = vld [vmem:[#allocation5 + $0xb8] sm:$0xf0]  ;;  %v1054_v57 = vor.u32 %v791_v51, %v666_v49  ;;  %v1056_v58 = vor.u32 %v774_v52, %v604_v53  ;;  %v594_v59 = vld [vmem:[#allocation5 + $0x20] sm:$0xf] }
  0x22   :  { %327 = vmatpush.bf16.msra.mxu3 %v1035_v38  ;;  %v773_v60 = vld [vmem:[#allocation5 + $0x24] sm:$0xf0]  ;;  %v658_v61 = vld [vmem:[#allocation5 + $0xa0] sm:$0xf]  ;;  %v1059_v62 = vor.u32 %v790_v54, %v668_v55  ;;  %v772_v0 = vld [vmem:[#allocation5 + $0x24] sm:$0xf] }
  0x23   :  { %289 = vmatpush.bf16.msra.mxu0 %v1038_v44  ;;  %v789_v63 = vld [vmem:[#allocation5 + $0xa4] sm:$0xf0]  ;;  %v596_v1 = vld [vmem:[#allocation5 + $0x28] sm:$0xf0]  ;;  %v788_v2 = vld [vmem:[#allocation5 + $0xa4] sm:$0xf]  ;;  %v1062_v5 = vor.u32 %v773_v60, %v594_v59 }
  0x24   :  { %302 = vmatpush.bf16.msra.mxu1 %v1042_v45  ;;  %v660_v4 = vld [vmem:[#allocation5 + $0xa8] sm:$0xf0]  ;;  %v586_v6 = vld [vmem:[#allocation5 + $0x10] sm:$0xf]  ;;  %v1066_v9 = vor.u32 %v789_v63, %v658_v61  ;;  %v1068_v10 = vor.u32 %v772_v0, %v596_v1  ;;  %v771_v11 = vld [vmem:[#allocation5 + $0x14] sm:$0xf0] }
  0x25   :  { %315 = vmatpush.bf16.msra.mxu2 %v1044_v46  ;;  %v650_v13 = vld [vmem:[#allocation5 + $0x90] sm:$0xf]  ;;  %v787_v14 = vld [vmem:[#allocation5 + $0x94] sm:$0xf0]  ;;  %v1071_v15 = vor.u32 %v788_v2, %v660_v4  ;;  %v770_v18 = vld [vmem:[#allocation5 + $0x14] sm:$0xf]  ;;  %v587_v23 = vor.u32 %v771_v11, %v586_v6 }
  0x26   :  { %328 = vmatpush.bf16.msra.mxu3 %v1047_v50  ;;  %v588_v19 = vld [vmem:[#allocation5 + $0x18] sm:$0xf0]  ;;  %v786_v20 = vld [vmem:[#allocation5 + $0x94] sm:$0xf]  ;;  %v651_v26 = vor.u32 %v787_v14, %v650_v13  ;;  %v578_v28 = vld [vmem:[#allocation5] sm:$0xf] }
  0x27   :  { %290 = vmatpush.bf16.msra.mxu0 %v1050_v56  ;;  %v652_v22 = vld [vmem:[#allocation5 + $0x98] sm:$0xf0]  ;;  %v591_v27 = vor.u32 %v770_v18, %v588_v19  ;;  %v769_v30 = vld [vmem:[#allocation5 + $0x4] sm:$0xf0]  ;;  %v642_v31 = vld [vmem:[#allocation5 + $0x80] sm:$0xf] }
  0x28   :  { %303 = vmatpush.bf16.msra.mxu1 %v1054_v57  ;;  %v113_v24 = vld [vmem:[#allocation2] sm:$0xff]  ;;  %v655_v32 = vor.u32 %v786_v20, %v652_v22  ;;  %v785_v35 = vld [vmem:[#allocation5 + $0x84] sm:$0xf0]  ;;  %v768_v36 = vld [vmem:[#allocation5 + $0x4] sm:$0xf]  ;;  %v579_v42 = vor.u32 %v769_v30, %v578_v28  ;;  %s962_s15 = smov [#allocation10]  }
  0x29   :  { %316 = vmatpush.bf16.msra.mxu2 %v1056_v58  ;;  %v580_v37 = vld [vmem:[#allocation5 + $0x8] sm:$0xf0]  ;;  %v784_v39 = vld [vmem:[#allocation5 + $0x84] sm:$0xf]  ;;  %v120_v41 = vunpack.c.l.b16 %v113_v24  ;;  %v121_v43 = vunpack.c.h.b16 %v113_v24  ;;  %v643_v47 = vor.u32 %v785_v35, %v642_v31  ;;  %v802_v1 = vld [vmem:[#allocation8 + $0x10] sm:$0xff]  ;;  %s562_s16 = sshll.u32 %s962_s15, 4  ;;  %s563_s16 = int_to_ptr.vmem [resolvable:$true] %s562_s16 }
  0x2a   :  { %329 = vmatpush.bf16.msra.mxu3 %v1059_v62  ;;  %v644_v40 = vld [vmem:[#allocation5 + $0x88] sm:$0xf0]  ;;  %v583_v48 = vor.u32 %v768_v36, %v580_v37  ;;  %v812_v0 = vld [vmem:[#allocation8 + $0x60] sm:$0xff]  ;;  %v811_v2 = vld [vmem:[#allocation8 + $0x58] sm:$0xff]  ;;  %s564_s19 = sshll.u32 %s1112_s5, 4  ;;  %s565_s19 = int_to_ptr.hbm [resolvable:$true] %s564_s19 }
  0x2b   :  { %291 = vmatpush.bf16.msra.mxu0 %v1062_v5  ;;  %v647_v49 = vor.u32 %v784_v39, %v644_v40  ;;  %v122_v51 = vpack.c.b16 %v120_v41, %v120_v41  ;;  %v123_v52 = vpack.c.b16 %v121_v43, %v121_v43  ;;  %v801_v4 = vld [vmem:[#allocation8 + $0x8] sm:$0xff]  ;;  %v800_v6 = vld [vmem:[#allocation8] sm:$0xff]  ;;  %v825_v36 = vld [vmem:[%s1111_s4] ss:$0 sm:$0xff] }
  0x2c   :  { %304 = vmatpush.bf16.msra.mxu1 %v1066_v9 }
  0x2d   :  { %317 = vmatpush.bf16.msra.mxu2 %v1068_v10 }
  0x2e   :  { %330 = vmatpush.bf16.msra.mxu3 %v1071_v15 }
  0x2f   :  { %292 = vmatpush.bf16.msra.mxu0 %v587_v23 }
  0x30   :  { %305 = vmatpush.bf16.msra.mxu1 %v651_v26 }
  0x31   :  { %318 = vmatpush.bf16.msra.mxu2 %v591_v27 }
  0x32   :  { %331 = vmatpush.bf16.msra.mxu3 %v655_v32 }
  0x33   :  { %293 = vmatpush.bf16.msra.mxu0 %v579_v42 }
  0x34   :  { %306 = vmatpush.bf16.msra.mxu1 %v643_v47 }
  0x35   :  { %319 = vmatpush.bf16.msra.mxu2 %v583_v48 }
  0x36   :  { %332 = vmatpush.bf16.msra.mxu3 %v647_v49  ;;  %294 = vmatmul.bf16.vlgmr.msra.gmra.mxu0 %v122_v51 }
  0x37   :  { %342 = vmatpush.bf16.msrb.mxu0 %v1005_v3  ;;  %307 = vmatmul.bf16.vlgmr.msra.gmra.mxu1 %v123_v52  ;;  %v807_v3 = vld [vmem:[#allocation8 + $0x38] sm:$0xff] }
  0x38   :  { %320 = vmatmul.bf16.vlgmr.msra.gmra.mxu2 %v122_v51  ;;  %355 = vmatpush.bf16.msrb.mxu1 %v1007_v7  ;;  %v815_v7 = vld [vmem:[#allocation8 + $0x78] sm:$0xff] }
  0x39   :  { %368 = vmatpush.bf16.msrb.mxu2 %v1009_v8  ;;  %333 = vmatmul.bf16.vlgmr.msra.gmra.mxu3 %v123_v52  ;;  %v806_v8 = vld [vmem:[#allocation8 + $0x30] sm:$0xff] }
  0x3a   :  { %381 = vmatpush.bf16.msrb.mxu3 %v1012_v12  ;;  %v814_v12 = vld [vmem:[#allocation8 + $0x70] sm:$0xff] }
  0x3b   :  { %343 = vmatpush.bf16.msrb.mxu0 %v1016_v16  ;;  %v805_v16 = vld [vmem:[#allocation8 + $0x28] sm:$0xff] }
  0x3c   :  { %356 = vmatpush.bf16.msrb.mxu1 %v1018_v17  ;;  %v813_v17 = vld [vmem:[#allocation8 + $0x68] sm:$0xff] }
  0x3d   :  { %369 = vmatpush.bf16.msrb.mxu2 %v1021_v21  ;;  %v112_v21 = vld [vmem:[#allocation7] sm:$0x3] }
  0x3e   :  { %382 = vmatpush.bf16.msrb.mxu3 %v1023_v25  ;;  %v804_v25 = vld [vmem:[#allocation8 + $0x20] sm:$0xff] }
  0x3f   :  { %344 = vmatpush.bf16.msrb.mxu0 %v1026_v29  ;;  %v115_v29 = vperm.slane %v112_v21, 0 }
  0x40   :  { %357 = vmatpush.bf16.msrb.mxu1 %v1030_v33  ;;  %v803_v33 = vld [vmem:[#allocation8 + $0x18] sm:$0xff] }
  0x41   :  { %370 = vmatpush.bf16.msrb.mxu2 %v1032_v34 }
  0x42   :  { %383 = vmatpush.bf16.msrb.mxu3 %v1035_v38 }
  0x43   :  { %345 = vmatpush.bf16.msrb.mxu0 %v1038_v44 }
  0x44   :  { %358 = vmatpush.bf16.msrb.mxu1 %v1042_v45 }
  0x45   :  { %371 = vmatpush.bf16.msrb.mxu2 %v1044_v46  ;;  %v116_v46 = vperm.slane %v112_v21, 1 }
  0x46   :  { %384 = vmatpush.bf16.msrb.mxu3 %v1047_v50 }
  0x47   :  { %346 = vmatpush.bf16.msrb.mxu0 %v1050_v56 }
  0x48   :  { %359 = vmatpush.bf16.msrb.mxu1 %v1054_v57 }
  0x49   :  { %372 = vmatpush.bf16.msrb.mxu2 %v1056_v58 }
  0x4a   :  { %385 = vmatpush.bf16.msrb.mxu3 %v1059_v62 }
  0x4b   :  { %347 = vmatpush.bf16.msrb.mxu0 %v1062_v5  ;;  %v810_v5 = vld [vmem:[#allocation8 + $0x50] sm:$0xff] }
  0x4c   :  { %360 = vmatpush.bf16.msrb.mxu1 %v1066_v9  ;;  %v809_v9 = vld [vmem:[#allocation8 + $0x48] sm:$0xff] }
  0x4d   :  { %373 = vmatpush.bf16.msrb.mxu2 %v1068_v10  ;;  %v808_v10 = vld [vmem:[#allocation8 + $0x40] sm:$0xff] }
  0x4e   :  { %386 = vmatpush.bf16.msrb.mxu3 %v1071_v15 }
  0x4f   :  { %348 = vmatpush.bf16.msrb.mxu0 %v587_v23 }
  0x50   :  { %361 = vmatpush.bf16.msrb.mxu1 %v651_v26 }
  0x51   :  { %374 = vmatpush.bf16.msrb.mxu2 %v591_v27 }
  0x52   :  { %387 = vmatpush.bf16.msrb.mxu3 %v655_v32 }
  0x53   :  { %349 = vmatpush.bf16.msrb.mxu0 %v579_v42 }
  0x54   :  { %362 = vmatpush.bf16.msrb.mxu1 %v643_v47 }
  0x55   :  { %375 = vmatpush.bf16.msrb.mxu2 %v583_v48 }
  0x56   :  { %388 = vmatpush.bf16.msrb.mxu3 %v647_v49 }
  0x57   :  { %530 = vmatpush.bf16.msra.mxu0 %v807_v3 }
  0x58   :  { %543 = vmatpush.bf16.msra.mxu1 %v815_v7 }
  0x5b   :  { %531 = vmatpush.bf16.msra.mxu0 %v806_v8 }
  0x5c   :  { %544 = vmatpush.bf16.msra.mxu1 %v814_v12 }
  0x5f   :  { %532 = vmatpush.bf16.msra.mxu0 %v805_v16 }
  0x60   :  { %545 = vmatpush.bf16.msra.mxu1 %v813_v17 }
  0x63   :  { %533 = vmatpush.bf16.msra.mxu0 %v804_v25 }
  0x64   :  { %546 = vmatpush.bf16.msra.mxu1 %v812_v0 }
  0x67   :  { %534 = vmatpush.bf16.msra.mxu0 %v803_v33 }
  0x68   :  { %547 = vmatpush.bf16.msra.mxu1 %v811_v2 }
  0x6b   :  { %535 = vmatpush.bf16.msra.mxu0 %v802_v1 }
  0x6c   :  { %548 = vmatpush.bf16.msra.mxu1 %v810_v5 }
  0x6f   :  { %536 = vmatpush.bf16.msra.mxu0 %v801_v4 }
  0x70   :  { %549 = vmatpush.bf16.msra.mxu1 %v809_v9 }
  0x73   :  { %537 = vmatpush.bf16.msra.mxu0 %v800_v6 }
  0x74   :  { %550 = vmatpush.bf16.msra.mxu1 %v808_v10 }
  0xb3   :  { %v295_v34 = vpop.f32.mrf.mxu0 }
  0xb4   :  { %v296_v38 = vadd.f32 %v295_v34, %v115_v29  ;;  %v308_v44 = vpop.f32.mrf.mxu1 }
  0xb6   :  { %v309_v45 = vadd.f32 %v308_v44, %v296_v38 }
  0xb8   :  { %v338_v50 = vmax.f32 %v309_v45, 0.0 }
  0xba   :  { %v340_v53 = vpack.c.bf16 %v338_v50, %v338_v50 }
  0xbb   :  { %v321_v54 = vpop.f32.mrf.mxu2  ;;  %v297_v57 = vpop.f32.mrf.mxu0 }
  0xbc   :  { %v322_v55 = vadd.f32 %v321_v54, %v116_v46  ;;  %v334_v56 = vpop.f32.mrf.mxu3  ;;  %v310_v58 = vpop.f32.mrf.mxu1  ;;  %350 = vmatmul.bf16.vlgmr.msrb.gmra.mxu0 %v340_v53  ;;  %376 = vmatmul.bf16.vlgmr.msrb.gmra.mxu2 %v340_v53 }
  0xbe   :  { %v335_v59 = vadd.f32 %v334_v56, %v322_v55 }
  0xc0   :  { %v339_v60 = vmax.f32 %v335_v59, 0.0 }
  0xc2   :  { %v341_v61 = vpack.c.bf16 %v339_v60, %v339_v60 }
  0xc3   :  { %v323_v62 = vpop.f32.mrf.mxu2 }
  0xc4   :  { %v336_v63 = vpop.f32.mrf.mxu3  ;;  %363 = vmatmul.bf16.vlgmr.msrb.gmra.mxu1 %v341_v61  ;;  %389 = vmatmul.bf16.vlgmr.msrb.gmra.mxu3 %v341_v61 }
 0x139   :  { %v351_v11 = vpop.f32.mrf.mxu0 }
 0x13a   :  { %v352_v13 = vadd.f32 %v351_v11, %v115_v29 }
 0x13f   :  { %v377_v14 = vpop.f32.mrf.mxu2 }
 0x140   :  { %v378_v22 = vadd.f32 %v377_v14, %v116_v46 }
 0x141   :  { %v364_v15 = vpop.f32.mrf.mxu1  ;;  %v353_v19 = vpop.f32.mrf.mxu0 }
 0x142   :  { %v365_v18 = vadd.f32 %v364_v15, %v352_v13 }
 0x144   :  { %v394_v20 = vmax.f32 %v365_v18, 0.0 }
 0x146   :  { %v396_v23 = vpack.c.bf16 %v394_v20, %v394_v20 }
 0x147   :  { %v390_v24 = vpop.f32.mrf.mxu3  ;;  %v379_v27 = vpop.f32.mrf.mxu2 }
 0x148   :  { %v391_v26 = vadd.f32 %v390_v24, %v378_v22  ;;  %538 = vmatmul.bf16.vlgmr.msra.gmra.mxu0 %v396_v23 }
 0x149   :  { %v366_v28 = vpop.f32.mrf.mxu1 }
 0x14a   :  { %v395_v30 = vmax.f32 %v391_v26, 0.0 }
 0x14c   :  { %v397_v31 = vpack.c.bf16 %v395_v30, %v395_v30 }
 0x14e   :  { %551 = vmatmul.bf16.vlgmr.msra.gmra.mxu1 %v397_v31 }
 0x14f   :  { %v392_v32 = vpop.f32.mrf.mxu3 }
 0x1c5   :  { %v539_v35 = vpop.f32.mrf.mxu0 }
 0x1c6   :  { %v540_v37 = vadd.f32 %v825_v36, %v539_v35 }
 0x1cb   :  { %v552_v39 = vpop.f32.mrf.mxu1 }
 0x1cc   :  { %v553_v40 = vadd.f32 %v552_v39, %v540_v37 }
 0x1cd   :  { %v541_v41 = vpop.f32.mrf.mxu0 }
 0x1ce   :  { %556 = vst [vmem:[#allocation10] sm:$0xff] %v553_v40 }
 0x1cf   :  { %567 = dma.vmem_to_hbm [thread:$0]  %s563_s16, 128, %s565_s19, [#allocation4]  }
 0x1d3   :  { %v554_v42 = vpop.f32.mrf.mxu1 }
 0x1d4   :  { %952 = dma.done.wait [#allocation4], 128  }
 0x1d5   :  { %953 = vsyncadd [#allocation4], 4294967168 }
 0x1d6   :  { %572 = vsyncpa [#allocation3], 1 }
 0x1d7   :  { %573 = vsyncpa [#allocation6], 1 }
 0x1d8   :  { %574 = vsyncpa [#allocation9], 1 }
 0x1d9   :  { %575 = vsyncpa [#allocation4], 1 }

</bundles_post_ra>
